<compile_context>
chip_gen: v7x
topology: tpu7x:2x2x1
jax: 0.10.0
libtpu: 0.0.40
codegen_flags: <defaults>
</compile_context>

<pallas_src>
import functools

import jax
import jax.numpy as jnp
from jax.experimental import pallas as pl
from jax.experimental.pallas import tpu as pltpu


def _round_up(v, m):
    return (v + m - 1) // m * m


def gcn_kernel(a_ref, x_ref, w_ref, b_ref, o_ref, acc_ref):
    """One (row-tile i, k-tile k) step of out = A @ (x @ W_t + b)."""
    k = pl.program_id(1)

    @pl.when(k == 0)
    def _():
        acc_ref[...] = jnp.zeros_like(acc_ref)

    # Linear on the K-slice of nodes: (TK, C_in) @ (C_in, C_out) -> (TK, C_out)
    h = jnp.dot(x_ref[...], w_ref[...],
                preferred_element_type=jnp.float32) + b_ref[...]
    # Aggregation partial sum: (TM, TK) @ (TK, C_out) -> (TM, C_out)
    acc_ref[...] += jnp.dot(a_ref[...], h, preferred_element_type=jnp.float32)

    @pl.when(k == pl.num_programs(1) - 1)
    def _():
        o_ref[...] = acc_ref[...].astype(o_ref.dtype)


@functools.partial(jax.jit, static_argnames=("tile",))
def gcn_layer(x, edge_index, weight, bias, *, tile=256):
    """Pallas GCN layer forward.

    x:          [N, C_in] float32 node features
    edge_index: [2, E]    int32   (row, col) edge endpoints
    weight:     [C_out, C_in] float32 (nn.Linear weight layout)
    bias:       [C_out]       float32
    returns:    [N, C_out] float32
    """
    n, c_in = x.shape
    c_out = weight.shape[0]

    row = edge_index[0]
    col = edge_index[1]

    # deg = bincount(row); deg_inv_sqrt = deg**-0.5; inf -> 0
    deg = jnp.bincount(row, length=n).astype(jnp.float32)
    deg_inv_sqrt = deg ** -0.5
    deg_inv_sqrt = jnp.where(jnp.isinf(deg_inv_sqrt), 0.0, deg_inv_sqrt)

    # Per-edge normalization scattered into a dense adjacency (duplicates sum,
    # matching sparse COO semantics).
    norm = deg_inv_sqrt[row] * deg_inv_sqrt[col]
    adj = jnp.zeros((n, n), dtype=jnp.float32).at[row, col].add(norm)

    # --- padding to TPU-friendly shapes -------------------------------------
    tm = tk = min(tile, _round_up(n, 128))        # square A tiles
    n_pad = _round_up(n, tm)
    c_in_pad = _round_up(c_in, 8)                  # sublane multiple
    c_out_pad = _round_up(c_out, 128)              # lane-dense output stores

    adj_p = jnp.zeros((n_pad, n_pad), jnp.float32).at[:n, :n].set(adj)
    x_p = jnp.zeros((n_pad, c_in_pad), jnp.float32).at[:n, :c_in].set(x)
    # Pre-transposed weight [C_in_pad, C_out_pad] -> no transpose in-kernel.
    w_t = jnp.zeros((c_in_pad, c_out_pad), jnp.float32).at[:c_in, :c_out].set(weight.T)
    b_p = jnp.zeros((1, c_out_pad), jnp.float32).at[0, :c_out].set(bias)

    grid = (n_pad // tm, n_pad // tk)

    out_p = pl.pallas_call(
        gcn_kernel,
        out_shape=jax.ShapeDtypeStruct((n_pad, c_out_pad), jnp.float32),
        grid_spec=pltpu.PrefetchScalarGridSpec(
            num_scalar_prefetch=0,
            grid=grid,
            in_specs=[
                pl.BlockSpec((tm, tk), lambda i, k: (i, k)),          # A tile
                pl.BlockSpec((tk, c_in_pad), lambda i, k: (k, 0)),    # x tile
                pl.BlockSpec((c_in_pad, c_out_pad), lambda i, k: (0, 0)),  # W_t
                pl.BlockSpec((1, c_out_pad), lambda i, k: (0, 0)),    # bias
            ],
            out_specs=pl.BlockSpec((tm, c_out_pad), lambda i, k: (i, 0)),
            scratch_shapes=[pltpu.VMEM((tm, c_out_pad), jnp.float32)],
        ),
        compiler_params=pltpu.CompilerParams(
            dimension_semantics=("parallel", "arbitrary"),
            vmem_limit_bytes=32 * 1024 * 1024,
        ),
    )(adj_p, x_p, w_t, b_p)

    return out_p[:n, :c_out]


def reference_gcn(x, edge_index, weight, bias):
    """Pure-JAX reference mirroring the PyTorch forward."""
    n = x.shape[0]
    row, col = edge_index[0], edge_index[1]
    deg = jnp.bincount(row, length=n).astype(jnp.float32)
    dis = deg ** -0.5
    dis = jnp.where(jnp.isinf(dis), 0.0, dis)
    norm = dis[row] * dis[col]
    h = x @ weight.T + bias
    adj = jnp.zeros((n, n), dtype=jnp.float32).at[row, col].add(norm)
    return adj @ h


if __name__ == "__main__":
    key = jax.random.PRNGKey(0)
    k_x, k_w, k_b = jax.random.split(key, 3)

    # Small, module-consistent shapes: N nodes with in/out feature dims.
    N, C_IN, C_OUT = 16, 8, 32

    x = jax.random.normal(k_x, (N, C_IN), dtype=jnp.float32)

    # Deterministic edge list: ring graph (both directions) + self loops.
    src = jnp.arange(N, dtype=jnp.int32)
    ring_fwd = jnp.stack([src, (src + 1) % N])
    ring_bwd = jnp.stack([src, (src - 1) % N])
    self_loop = jnp.stack([src, src])
    edge_index = jnp.concatenate([ring_fwd, ring_bwd, self_loop], axis=1)  # [2, 3N]

    # nn.Linear(in, out) default init: U(-1/sqrt(in), 1/sqrt(in)) for W and b.
    bound = 1.0 / (C_IN ** 0.5)
    weight = jax.random.uniform(k_w, (C_OUT, C_IN), jnp.float32, -bound, bound)
    bias = jax.random.uniform(k_b, (C_OUT,), jnp.float32, -bound, bound)

    out = gcn_layer(x, edge_index, weight, bias)
    out = jax.block_until_ready(out)

    ref = reference_gcn(x, edge_index, weight, bias)
    assert out.shape == (N, C_OUT)
    assert jnp.allclose(out, ref, atol=1e-4, rtol=1e-4)

    print("KERNEL_OK")
</pallas_src>

<mosaic_0001>
module attributes {stable_mosaic.version = 11 : i64} {
  func.func private @main(%arg0: i32) attributes {dimension_semantics = [#tpu.dimension_semantics<core_parallel>], iteration_bounds = array<i64: 2>, tpu.core_type = #tpu.core_type<sc_scalar_subcore>, window_params = []} {
    return
  }
}

module attributes {stable_mosaic.version = 11 : i64} {
  func.func private @main(%arg0: i32) attributes {dimension_semantics = [#tpu.dimension_semantics<core_parallel>], iteration_bounds = array<i64: 2>, tpu.core_type = #tpu.core_type<sc_scalar_subcore>, window_params = []} {
    return
  }
}

module attributes {stable_mosaic.version = 11 : i64} {
  func.func @gcn_kernel(%arg0: i32, %arg1: i32, %arg2: memref<128x128xf32, #tpu.memory_space<vmem>>, %arg3: memref<128x8xf32, #tpu.memory_space<vmem>>, %arg4: memref<8x128xf32, #tpu.memory_space<vmem>>, %arg5: memref<1x128xf32, #tpu.memory_space<vmem>>, %arg6: memref<128x128xf32, #tpu.memory_space<vmem>>, %arg7: memref<128x128xf32, #tpu.memory_space<vmem>>) attributes {dimension_semantics = [#tpu.dimension_semantics<parallel>, #tpu.dimension_semantics<arbitrary>], iteration_bounds = array<i64: 1, 1>, scalar_prefetch = 0 : i64, scratch_operands = 1 : i64, tpu.core_type = #tpu.core_type<tc>, window_params = [{transform_indices = @transform_0, window_bounds = array<i64: 128, 128>}, {transform_indices = @transform_1, window_bounds = array<i64: 128, 8>}, {pipeline_mode = #tpu.pipeline_mode<synchronous>, transform_indices = @transform_2, window_bounds = array<i64: 8, 128>}, {pipeline_mode = #tpu.pipeline_mode<synchronous>, transform_indices = @transform_3, window_bounds = array<i64: 1, 128>}, {transform_indices = @transform_4, window_bounds = array<i64: 128, 128>}]} {
    %c0_i32 = arith.constant 0 : i32
    %0 = arith.cmpi eq, %arg1, %c0_i32 : i32
    %1 = arith.extui %0 : i1 to i32
    %c0_i32_0 = arith.constant 0 : i32
    %2 = arith.cmpi ne, %1, %c0_i32_0 : i32
    scf.if %2 {
      %cst_15 = arith.constant 0.000000e+00 : f32
      %17 = vector.broadcast %cst_15 : f32 to vector<128x128xf32>
      %c0_16 = arith.constant 0 : index
      %c0_17 = arith.constant 0 : index
      %18 = vector.load %arg7[%c0_16, %c0_17] : memref<128x128xf32, #tpu.memory_space<vmem>>, vector<128x128xf32>
      tpu.vector_store %arg7[%c0_16, %c0_17], %17 {strides = array<i32>} : memref<128x128xf32, #tpu.memory_space<vmem>>, vector<128x128xf32>,
    } else {
    }
    %c0 = arith.constant 0 : index
    %c0_1 = arith.constant 0 : index
    %3 = vector.load %arg3[%c0, %c0_1] : memref<128x8xf32, #tpu.memory_space<vmem>>, vector<128x8xf32>
    %c0_2 = arith.constant 0 : index
    %c0_3 = arith.constant 0 : index
    %4 = vector.load %arg4[%c0_2, %c0_3] : memref<8x128xf32, #tpu.memory_space<vmem>>, vector<8x128xf32>
    %cst = arith.constant dense<0.000000e+00> : vector<128x128xf32>
    %5 = tpu.matmul %3, %4, %cst {dimension_numbers = #tpu.dot_dimension_numbers<[1], [0], [0], [1], [0, 0, 1, 1], [], []>} : vector<128x8xf32>, vector<8x128xf32>, vector<128x128xf32> -> vector<128x128xf32>
    %c0_4 = arith.constant 0 : index
    %c0_5 = arith.constant 0 : index
    %6 = vector.load %arg5[%c0_4, %c0_5] : memref<1x128xf32, #tpu.memory_space<vmem>>, vector<1x128xf32>
    %7 = vector.broadcast %6 : vector<1x128xf32> to vector<128x128xf32>
    %8 = arith.addf %5, %7 : vector<128x128xf32>
    %c0_6 = arith.constant 0 : index
    %c0_7 = arith.constant 0 : index
    %9 = vector.load %arg7[%c0_6, %c0_7] : memref<128x128xf32, #tpu.memory_space<vmem>>, vector<128x128xf32>
    %c0_8 = arith.constant 0 : index
    %c0_9 = arith.constant 0 : index
    %10 = vector.load %arg2[%c0_8, %c0_9] : memref<128x128xf32, #tpu.memory_space<vmem>>, vector<128x128xf32>
    %cst_10 = arith.constant dense<0.000000e+00> : vector<128x128xf32>
    %11 = tpu.matmul %10, %8, %cst_10 {dimension_numbers = #tpu.dot_dimension_numbers<[1], [0], [0], [1], [0, 0, 1, 1], [], []>} : vector<128x128xf32>, vector<128x128xf32>, vector<128x128xf32> -> vector<128x128xf32>
    %12 = arith.addf %9, %11 : vector<128x128xf32>
    %c0_11 = arith.constant 0 : index
    %c0_12 = arith.constant 0 : index
    %13 = vector.load %arg7[%c0_11, %c0_12] : memref<128x128xf32, #tpu.memory_space<vmem>>, vector<128x128xf32>
    tpu.vector_store %arg7[%c0_11, %c0_12], %12 {strides = array<i32>} : memref<128x128xf32, #tpu.memory_space<vmem>>, vector<128x128xf32>,
    %c0_i32_13 = arith.constant 0 : i32
    %14 = arith.cmpi eq, %arg1, %c0_i32_13 : i32
    %15 = arith.extui %14 : i1 to i32
    %c0_i32_14 = arith.constant 0 : i32
    %16 = arith.cmpi ne, %15, %c0_i32_14 : i32
    scf.if %16 {
      %c0_15 = arith.constant 0 : index
      %c0_16 = arith.constant 0 : index
      %17 = vector.load %arg7[%c0_15, %c0_16] : memref<128x128xf32, #tpu.memory_space<vmem>>, vector<128x128xf32>
      %c0_17 = arith.constant 0 : index
      %c0_18 = arith.constant 0 : index
      %18 = vector.load %arg6[%c0_17, %c0_18] : memref<128x128xf32, #tpu.memory_space<vmem>>, vector<128x128xf32>
      tpu.vector_store %arg6[%c0_17, %c0_18], %17 {strides = array<i32>} : memref<128x128xf32, #tpu.memory_space<vmem>>, vector<128x128xf32>,
    } else {
    }
    return
  }
  func.func @transform_0(%arg0: i32, %arg1: i32) -> (i32, i32) {
    %c0_i32 = arith.constant 0 : i32
    return %arg0, %arg1 : i32, i32
  }
  func.func @transform_1(%arg0: i32, %arg1: i32) -> (i32, i32) {
    %c0_i32 = arith.constant 0 : i32
    %c0_i32_0 = arith.constant 0 : i32
    return %arg1, %c0_i32 : i32, i32
  }
  func.func @transform_2(%arg0: i32, %arg1: i32) -> (i32, i32) {
    %c0_i32 = arith.constant 0 : i32
    %c0_i32_0 = arith.constant 0 : i32
    %c0_i32_1 = arith.constant 0 : i32
    return %c0_i32, %c0_i32_0 : i32, i32
  }
  func.func @transform_3(%arg0: i32, %arg1: i32) -> (i32, i32) {
    %c0_i32 = arith.constant 0 : i32
    %c0_i32_0 = arith.constant 0 : i32
    %c0_i32_1 = arith.constant 0 : i32
    return %c0_i32, %c0_i32_0 : i32, i32
  }
  func.func @transform_4(%arg0: i32, %arg1: i32) -> (i32, i32) {
    %c0_i32 = arith.constant 0 : i32
    %c0_i32_0 = arith.constant 0 : i32
    return %arg0, %c0_i32 : i32, i32
  }
}

</mosaic_0001>

<bundles_post_ra>
// kernel: mul.1
= control target key start
LH: loop header
LB: loop body
LE: loop exit
PB: predicated region body
PF: predicated region fallthrough
CT: control target
= control target key end

     0   :  { %s34_s0 = inlined_call_operand.vmem [shape: f32[48], index: 0, kind: input, shape index: {}]   ;;  %s35_s1 = inlined_call_operand.vmem [shape: f32[48], index: 1, kind: input, shape index: {}]   ;;  %s36_s2 = inlined_call_operand.vmem [shape: f32[48], index: 2, kind: output, shape index: {}]  }
   0x1   :  { %v3_v0 = vld [vmem:[%s34_s0] sm:$0x1] }
   0x2   :  { %v4_v1 = vld [vmem:[%s35_s1] sm:$0x1] }
   0x3   :  { %v7_v2 = vmul.f32 %v4_v1, %v3_v0 }
   0x5   :  { %9 = vst [vmem:[%s36_s2] sm:$0x1] %v7_v2 }

// kernel: gcn_layer.1
= control target key start
LH: loop header
LB: loop body
LE: loop exit
PB: predicated region body
PF: predicated region fallthrough
CT: control target
= control target key end

     0   :  { %vm61_vm0 = vcmask 64512   ;;  %s908_s2 = inlined_call_operand.vmem [shape: f32[8,128], index: 2, kind: input, shape index: {}]   ;;  %s909_s1 = inlined_call_operand.vmem [shape: f32[128,8], index: 1, kind: input, shape index: {}]   ;;  %s910_s0 = inlined_call_operand.vmem [shape: f32[128,128], index: 0, kind: input, shape index: {}]   ;;  %s911_s3 = inlined_call_operand.vmem [shape: f32[1,128], index: 3, kind: input, shape index: {}]   ;;  %s912_s4 = inlined_call_operand.vmem [shape: f32[128,128], index: 4, kind: output, shape index: {}]  }
   0x1   :  { %v53_v0 = vld [vmem:[%s908_s2] sm:$0xff]  ;;  %v38_v2 = vld [vmem:[%s909_s1 + $0x8] sm:$0xff]  ;;  %v39_v3 = vld [vmem:[%s909_s1 + $0x10] sm:$0xff] }
   0x2   :  { %v37_v1 = vld [vmem:[%s909_s1] sm:$0xff]  ;;  %569 = vmatprep.subr.mxu0 %v53_v0  ;;  %v40_v4 = vld [vmem:[%s909_s1 + $0x18] sm:$0xff]  ;;  %v42_v6 = vld [vmem:[%s909_s1 + $0x28] sm:$0xff] }
   0x3   :  { %571 = vmatprep.mubr.msk.f32.mxu0 %vm61_vm0, %v37_v1  ;;  %570 = vmatpush3.msra.mxu0 %v53_v0  ;;  %v41_v5 = vld [vmem:[%s909_s1 + $0x20] sm:$0xff]  ;;  %v43_v7 = vld [vmem:[%s909_s1 + $0x30] sm:$0xff]  ;;  %v44_v8 = vld [vmem:[%s909_s1 + $0x38] sm:$0xff] }
   0x4   :  { %572 = vmatmul.mubr.msk.f32.vlgmr.msra.gmra.mrb[0].mxu0 %vm61_vm0, %v38_v2  ;;  %v45_v9 = vld [vmem:[%s909_s1 + $0x40] sm:$0xff]  ;;  %v46_v10 = vld [vmem:[%s909_s1 + $0x48] sm:$0xff]  ;;  %v47_v11 = vld [vmem:[%s909_s1 + $0x50] sm:$0xff] }
   0x5   :  { %574 = vmatprep.mubr.msk.f32.mxu0 %vm61_vm0, %v39_v3  ;;  %v48_v12 = vld [vmem:[%s909_s1 + $0x58] sm:$0xff]  ;;  %v49_v13 = vld [vmem:[%s909_s1 + $0x60] sm:$0xff]  ;;  %v50_v14 = vld [vmem:[%s909_s1 + $0x68] sm:$0xff] }
   0x6   :  { %v51_v15 = vld [vmem:[%s909_s1 + $0x70] sm:$0xff]  ;;  %v52_v16 = vld [vmem:[%s909_s1 + $0x78] sm:$0xff]  ;;  %v271_v18 = vld [vmem:[%s910_s0] sm:$0xff] }
   0x7   :  { %v277_v17 = vld [vmem:[%s910_s0 + $0x30] sm:$0xff]  ;;  %v800_v19 = vld [vmem:[%s911_s3] ss:$0 sm:$0xff]  ;;  %v278_v60 = vld [vmem:[%s910_s0 + $0x38] sm:$0xff] }
   0x8   :  { %575 = vmatmul.mubr.msk.f32.gmra.mrb[2].mxu0 %vm61_vm0, %v40_v4  ;;  %636 = vmatprep.mubr.f32.mxu1 %v277_v17  ;;  %v272_v61 = vld [vmem:[%s910_s0 + $0x8] sm:$0xff]  ;;  %v279_v62 = vld [vmem:[%s910_s0 + $0x40] sm:$0xff]  ;;  %v273_v63 = vld [vmem:[%s910_s0 + $0x10] sm:$0xff] }
   0x9   :  { %577 = vmatprep.mubr.msk.f32.mxu0 %vm61_vm0, %v41_v5  ;;  %v280_v0 = vld [vmem:[%s910_s0 + $0x48] sm:$0xff]  ;;  %v274_v1 = vld [vmem:[%s910_s0 + $0x18] sm:$0xff]  ;;  %v281_v2 = vld [vmem:[%s910_s0 + $0x50] sm:$0xff] }
   0xa   :  { %v275_v3 = vld [vmem:[%s910_s0 + $0x20] sm:$0xff]  ;;  %v282_v4 = vld [vmem:[%s910_s0 + $0x58] sm:$0xff]  ;;  %v276_v5 = vld [vmem:[%s910_s0 + $0x28] sm:$0xff] }
   0xc   :  { %578 = vmatmul.mubr.msk.f32.gmra.mrb[4].mxu0 %vm61_vm0, %v42_v6  ;;  %v283_v6 = vld [vmem:[%s910_s0 + $0x60] sm:$0xff] }
   0xd   :  { %580 = vmatprep.mubr.msk.f32.mxu0 %vm61_vm0, %v43_v7  ;;  %v284_v7 = vld [vmem:[%s910_s0 + $0x68] sm:$0xff] }
  0x10   :  { %581 = vmatmul.mubr.msk.f32.gmra.mrb[6].mxu0 %vm61_vm0, %v44_v8  ;;  %v285_v8 = vld [vmem:[%s910_s0 + $0x70] sm:$0xff] }
  0x11   :  { %583 = vmatprep.mubr.msk.f32.mxu0 %vm61_vm0, %v45_v9  ;;  %v286_v9 = vld [vmem:[%s910_s0 + $0x78] sm:$0xff] }
  0x14   :  { %584 = vmatmul.mubr.msk.f32.gmra.mrb[8].mxu0 %vm61_vm0, %v46_v10 }
  0x15   :  { %586 = vmatprep.mubr.msk.f32.mxu0 %vm61_vm0, %v47_v11 }
  0x18   :  { %587 = vmatmul.mubr.msk.f32.gmra.mrb[10].mxu0 %vm61_vm0, %v48_v12 }
  0x19   :  { %589 = vmatprep.mubr.msk.f32.mxu0 %vm61_vm0, %v49_v13 }
  0x1c   :  { %590 = vmatmul.mubr.msk.f32.gmra.mrb[12].mxu0 %vm61_vm0, %v50_v14 }
  0x1d   :  { %592 = vmatprep.mubr.msk.f32.mxu0 %vm61_vm0, %v51_v15 }
  0x20   :  { %593 = vmatmul.mubr.msk.f32.gmra.mrb[14].mxu0 %vm61_vm0, %v52_v16 }
  0x21   :  { %627 = vmatprep.mubr.f32.mxu0 %v271_v18 }
  0xd7   :  { %v573_v20 = vpop.f32.mrb[0].mxu0 }
  0xd8   :  { %v182_v21 = vadd.f32 %v573_v20, %v800_v19  ;;  %v176_v22 = vpop.f32.mrb[1].mxu0 }
  0xd9   :  { %v177_v23 = vadd.f32 %v800_v19, %v176_v22 }
  0xdb   :  { %v651_v24 = vpack.c.bf16 %v182_v21, %v177_v23  ;;  %v576_v25 = vpop.f32.mrb[2].mxu0 }
  0xdc   :  { %v192_v26 = vadd.f32 %v576_v25, %v800_v19  ;;  %v186_v27 = vpop.f32.mrb[3].mxu0 }
  0xdd   :  { %v187_v28 = vadd.f32 %v800_v19, %v186_v27  ;;  %652 = vmatprep.subr.bf16.mxu0 %v651_v24  ;;  %683 = vmatprep.subr.bf16.mxu1 %v651_v24 }
  0xde   :  { %654 = vmatpush3.bf16.msra.mxu0 %v651_v24  ;;  %691 = vmatpush3.bf16.msra.mxu1 %v651_v24 }
  0xdf   :  { %v655_v29 = vpack.c.bf16 %v192_v26, %v187_v28  ;;  %v579_v30 = vpop.f32.mrb[4].mxu0 }
  0xe0   :  { %v202_v31 = vadd.f32 %v579_v30, %v800_v19  ;;  %v196_v32 = vpop.f32.mrb[5].mxu0 }
  0xe1   :  { %v197_v33 = vadd.f32 %v800_v19, %v196_v32  ;;  %656 = vmatprep.subr.bf16.mxu0 %v655_v29  ;;  %684 = vmatprep.subr.bf16.mxu1 %v655_v29 }
  0xe2   :  { %658 = vmatpush3.bf16.msra.mxu0 %v655_v29  ;;  %692 = vmatpush3.bf16.msra.mxu1 %v655_v29 }
  0xe3   :  { %v659_v34 = vpack.c.bf16 %v202_v31, %v197_v33  ;;  %v582_v35 = vpop.f32.mrb[6].mxu0 }
  0xe4   :  { %v212_v36 = vadd.f32 %v582_v35, %v800_v19  ;;  %v206_v37 = vpop.f32.mrb[7].mxu0 }
  0xe5   :  { %v207_v38 = vadd.f32 %v800_v19, %v206_v37  ;;  %660 = vmatprep.subr.bf16.mxu0 %v659_v34  ;;  %685 = vmatprep.subr.bf16.mxu1 %v659_v34 }
  0xe6   :  { %662 = vmatpush3.bf16.msra.mxu0 %v659_v34  ;;  %693 = vmatpush3.bf16.msra.mxu1 %v659_v34 }
  0xe7   :  { %v663_v39 = vpack.c.bf16 %v212_v36, %v207_v38  ;;  %v585_v40 = vpop.f32.mrb[8].mxu0 }
  0xe8   :  { %v222_v41 = vadd.f32 %v585_v40, %v800_v19  ;;  %v216_v42 = vpop.f32.mrb[9].mxu0 }
  0xe9   :  { %v217_v43 = vadd.f32 %v800_v19, %v216_v42  ;;  %664 = vmatprep.subr.bf16.mxu0 %v663_v39  ;;  %686 = vmatprep.subr.bf16.mxu1 %v663_v39 }
  0xea   :  { %666 = vmatpush3.bf16.msra.mxu0 %v663_v39  ;;  %694 = vmatpush3.bf16.msra.mxu1 %v663_v39 }
  0xeb   :  { %v667_v44 = vpack.c.bf16 %v222_v41, %v217_v43  ;;  %v588_v45 = vpop.f32.mrb[10].mxu0 }
  0xec   :  { %v232_v46 = vadd.f32 %v588_v45, %v800_v19  ;;  %v226_v47 = vpop.f32.mrb[11].mxu0 }
  0xed   :  { %v227_v48 = vadd.f32 %v800_v19, %v226_v47  ;;  %668 = vmatprep.subr.bf16.mxu0 %v667_v44  ;;  %687 = vmatprep.subr.bf16.mxu1 %v667_v44 }
  0xee   :  { %670 = vmatpush3.bf16.msra.mxu0 %v667_v44  ;;  %695 = vmatpush3.bf16.msra.mxu1 %v667_v44 }
  0xef   :  { %v671_v49 = vpack.c.bf16 %v232_v46, %v227_v48  ;;  %v591_v50 = vpop.f32.mrb[12].mxu0 }
  0xf0   :  { %v242_v51 = vadd.f32 %v591_v50, %v800_v19  ;;  %v236_v52 = vpop.f32.mrb[13].mxu0 }
  0xf1   :  { %v237_v53 = vadd.f32 %v800_v19, %v236_v52  ;;  %672 = vmatprep.subr.bf16.mxu0 %v671_v49  ;;  %688 = vmatprep.subr.bf16.mxu1 %v671_v49 }
  0xf2   :  { %674 = vmatpush3.bf16.msra.mxu0 %v671_v49  ;;  %696 = vmatpush3.bf16.msra.mxu1 %v671_v49 }
  0xf3   :  { %v675_v54 = vpack.c.bf16 %v242_v51, %v237_v53  ;;  %v594_v55 = vpop.f32.mrb[14].mxu0 }
  0xf4   :  { %v252_v56 = vadd.f32 %v594_v55, %v800_v19  ;;  %v246_v57 = vpop.f32.mrb[15].mxu0 }
  0xf5   :  { %v247_v58 = vadd.f32 %v800_v19, %v246_v57  ;;  %676 = vmatprep.subr.bf16.mxu0 %v675_v54  ;;  %689 = vmatprep.subr.bf16.mxu1 %v675_v54 }
  0xf6   :  { %678 = vmatpush3.bf16.msra.mxu0 %v675_v54  ;;  %697 = vmatpush3.bf16.msra.mxu1 %v675_v54 }
  0xf7   :  { %v679_v59 = vpack.c.bf16 %v252_v56, %v247_v58 }
  0xf9   :  { %680 = vmatprep.subr.bf16.mxu0 %v679_v59  ;;  %690 = vmatprep.subr.bf16.mxu1 %v679_v59 }
  0xfa   :  { %682 = vmatpush3.bf16.msra.mxu0 %v679_v59  ;;  %698 = vmatpush3.bf16.msra.mxu1 %v679_v59 }
  0xfd   :  { %637 = vmatmul.mubr.f32.vlgmr.msra.gmra.mrb[0].mxu1 %v278_v60  ;;  %628 = vmatmul.mubr.f32.vlgmr.msra.gmra.mrb[16].mxu0 %v272_v61 }
  0xfe   :  { %639 = vmatprep.mubr.f32.mxu1 %v279_v62  ;;  %630 = vmatprep.mubr.f32.mxu0 %v273_v63 }
 0x101   :  { %640 = vmatmul.mubr.f32.gmra.mrb[2].mxu1 %v280_v0  ;;  %631 = vmatmul.mubr.f32.gmra.mrb[18].mxu0 %v274_v1 }
 0x102   :  { %642 = vmatprep.mubr.f32.mxu1 %v281_v2  ;;  %633 = vmatprep.mubr.f32.mxu0 %v275_v3 }
 0x105   :  { %643 = vmatmul.mubr.f32.gmra.mrb[4].mxu1 %v282_v4  ;;  %634 = vmatmul.mubr.f32.gmra.mrb[20].mxu0 %v276_v5 }
 0x106   :  { %645 = vmatprep.mubr.f32.mxu1 %v283_v6 }
 0x109   :  { %646 = vmatmul.mubr.f32.gmra.mrb[6].mxu1 %v284_v7 }
 0x10a   :  { %648 = vmatprep.mubr.f32.mxu1 %v285_v8 }
 0x10d   :  { %649 = vmatmul.mubr.f32.gmra.mrb[8].mxu1 %v286_v9 }
 0x1d0   :  { %v638_v10 = vpop.f32.mrb[0].mxu1  ;;  %v629_v11 = vpop.f32.mrb[16].mxu0 }
 0x1d1   :  { %490 = vst [vmem:[%s912_s4 + $0x38] sm:$0xff] %v638_v10  ;;  %v383_v12 = vpop.f32.mrb[1].mxu1  ;;  %484 = vst [vmem:[%s912_s4 + $0x8] sm:$0xff] %v629_v11  ;;  %v353_v13 = vpop.f32.mrb[17].mxu0 }
 0x1d2   :  { %489 = vst [vmem:[%s912_s4 + $0x30] sm:$0xff] %v383_v12  ;;  %483 = vst [vmem:[%s912_s4] sm:$0xff] %v353_v13 }
 0x1d4   :  { %v641_v14 = vpop.f32.mrb[2].mxu1  ;;  %v632_v15 = vpop.f32.mrb[18].mxu0 }
 0x1d5   :  { %492 = vst [vmem:[%s912_s4 + $0x48] sm:$0xff] %v641_v14  ;;  %v393_v16 = vpop.f32.mrb[3].mxu1  ;;  %486 = vst [vmem:[%s912_s4 + $0x18] sm:$0xff] %v632_v15  ;;  %v363_v17 = vpop.f32.mrb[19].mxu0 }
 0x1d6   :  { %491 = vst [vmem:[%s912_s4 + $0x40] sm:$0xff] %v393_v16  ;;  %485 = vst [vmem:[%s912_s4 + $0x10] sm:$0xff] %v363_v17 }
 0x1d8   :  { %v644_v18 = vpop.f32.mrb[4].mxu1  ;;  %v635_v19 = vpop.f32.mrb[20].mxu0 }
 0x1d9   :  { %494 = vst [vmem:[%s912_s4 + $0x58] sm:$0xff] %v644_v18  ;;  %v403_v20 = vpop.f32.mrb[5].mxu1  ;;  %488 = vst [vmem:[%s912_s4 + $0x28] sm:$0xff] %v635_v19  ;;  %v373_v21 = vpop.f32.mrb[21].mxu0 }
 0x1da   :  { %493 = vst [vmem:[%s912_s4 + $0x50] sm:$0xff] %v403_v20  ;;  %487 = vst [vmem:[%s912_s4 + $0x20] sm:$0xff] %v373_v21 }
 0x1dc   :  { %v647_v22 = vpop.f32.mrb[6].mxu1 }
 0x1dd   :  { %496 = vst [vmem:[%s912_s4 + $0x68] sm:$0xff] %v647_v22  ;;  %v413_v23 = vpop.f32.mrb[7].mxu1 }
 0x1de   :  { %495 = vst [vmem:[%s912_s4 + $0x60] sm:$0xff] %v413_v23 }
 0x1e0   :  { %v650_v24 = vpop.f32.mrb[8].mxu1 }
 0x1e1   :  { %498 = vst [vmem:[%s912_s4 + $0x78] sm:$0xff] %v650_v24  ;;  %v423_v25 = vpop.f32.mrb[9].mxu1 }
 0x1e2   :  { %497 = vst [vmem:[%s912_s4 + $0x70] sm:$0xff] %v423_v25 }

</bundles_post_ra>
